<compile_context>
chip_gen: v6e
topology: v6e:2x2x1
jax: 0.10.0
libtpu: 0.0.40
codegen_flags: <defaults>
</compile_context>

<pallas_src>
import functools

import jax
import jax.numpy as jnp
from jax.experimental import pallas as pl
from jax.experimental.pallas import tpu as pltpu
import numpy as np

# ----------------------- model dims (small test shapes) -----------------------
BATCH = 2
SEQ = 8            # == input_size in the PyTorch module (fc expects H * input_size)
FEAT = 2           # LSTM input feature size (hard-coded 2 in the module)
HIDDEN = 32        # 4H = 128 -> gates fill exactly one vreg lane width
OUT = 1

SUBLANE = 8
LANE = 128


def _round_up(x, m):
    return ((x + m - 1) // m) * m


# ------------------------------ Pallas kernel --------------------------------
def _lstm_fc_kernel(x_ref, wih_ref, whh_ref, b_ref, wfc_ref, bfc_ref,
                    out_ref, *, T, Bp, H, F):
    # x_ref   : (T*Bp, F)   f32   time-major, batch-padded input (row = t*Bp + b)
    # wih_ref : (F, 4H)     f32   W_ih^T
    # whh_ref : (H, 4H)     bf16  W_hh^T (pre-cast in wrapper)
    # b_ref   : (1, 4H)     f32   b_ih + b_hh
    # wfc_ref : (T*H, Op)   f32   fc weight (w_fc.T), zero-padded lanes
    # bfc_ref : (1, Op)     f32   fc bias, zero-padded lanes
    # out_ref : (Bp, Op)    f32

    # Loop-invariant loads, hoisted once (wfc stays in VMEM; sliced per step).
    x = x_ref[...]                                            # (T*Bp, F)
    wih = wih_ref[...]                                        # (F, 4H)
    whh = whh_ref[...]                                        # (H, 4H) bf16
    b = b_ref[...]                                            # (1, 4H)
    Op = out_ref.shape[1]

    # Input projection on the VPU (F == 2): broadcast FMAs, no MXU pass,
    # shorter prologue before the serial recurrence can start.
    xproj = jnp.broadcast_to(b, (T * Bp, 4 * H))              # (T*Bp, 4H)
    for f in range(F):
        xproj = xproj + x[:, f:f + 1] * wih[f:f + 1, :]

    h = jnp.zeros((Bp, H), jnp.float32)
    c = jnp.zeros((Bp, H), jnp.float32)
    acc = jnp.zeros((Bp, Op), jnp.float32)                    # fused-fc accumulator

    # Fully unrolled recurrence: per-step critical path = one bf16 MXU dot
    # + one sigmoid + one tanh EUP pass + VPU elementwise.
    for t in range(T):
        gates = xproj[t * Bp:(t + 1) * Bp, :] + jnp.dot(
            h.astype(jnp.bfloat16), whh,
            preferred_element_type=jnp.float32)               # (Bp, 4H)
        sig = jax.nn.sigmoid(gates)                           # full-width EUP pass
        tnh = jnp.tanh(gates)                                 # full-width EUP pass
        i_g = sig[:, 0 * H:1 * H]
        f_g = sig[:, 1 * H:2 * H]
        g_g = tnh[:, 2 * H:3 * H]
        o_g = sig[:, 3 * H:4 * H]
        c = f_g * c + i_g * g_g
        h = o_g * jnp.tanh(c)
        # Fused fc contribution for this step: rides the MXU slack during the
        # EUP/VPU phase; static weight slice loaded straight from VMEM.
        acc = acc + jnp.dot(h, wfc_ref[t * H:(t + 1) * H, :],
                            preferred_element_type=jnp.float32)

    out_ref[...] = acc + bfc_ref[...]                         # lane-dense unmasked store


def lstm_combined_forward(x, params):
    """x: (B, T, F) float32.  Returns (B, OUT) matching the PyTorch module."""
    w_ih, w_hh, b_ih, b_hh, w_fc, b_fc = params
    B, T, F = x.shape
    H = w_hh.shape[1]
    O = w_fc.shape[0]

    Bp = _round_up(max(B, SUBLANE), SUBLANE)    # pad batch to full sublanes
    Op = _round_up(max(O, LANE), LANE)          # lane-dense output

    # ---- layout plumbing (no compute) ----
    x_tm = jnp.transpose(x, (1, 0, 2))                          # (T, B, F)
    x_tm = jnp.pad(x_tm, ((0, 0), (0, Bp - B), (0, 0)))         # (T, Bp, F)
    x2d = x_tm.reshape(T * Bp, F)                               # (T*Bp, F)

    wih_t = w_ih.T                                              # (F, 4H)
    whh_t = w_hh.T.astype(jnp.bfloat16)                         # (H, 4H) bf16 (cast once)
    b = (b_ih + b_hh).reshape(1, 4 * H)                         # (1, 4H)
    wfc_t = jnp.pad(w_fc.T, ((0, 0), (0, Op - O)))              # (T*H, Op)
    bfc = jnp.pad(b_fc.reshape(1, O), ((0, 0), (0, Op - O)))    # (1, Op)

    kernel = functools.partial(_lstm_fc_kernel, T=T, Bp=Bp, H=H, F=F)
    vmem_spec = pl.BlockSpec(memory_space=pltpu.MemorySpace.VMEM)

    # Gridless single invocation: whole working set is a few hundred KiB,
    # far below VMEM on any generation (v7x 64 MiB included).
    out_p = pl.pallas_call(
        kernel,
        out_shape=jax.ShapeDtypeStruct((Bp, Op), jnp.float32),
        in_specs=[vmem_spec] * 6,
        out_specs=vmem_spec,
    )(x2d, wih_t, whh_t, b, wfc_t, bfc)

    return out_p[:B, :O]


# ------------------------- pure-JAX reference (check) -------------------------
def reference_forward(x, params):
    w_ih, w_hh, b_ih, b_hh, w_fc, b_fc = params
    B, T, F = x.shape
    H = w_hh.shape[1]
    h = jnp.zeros((B, H), jnp.float32)
    c = jnp.zeros((B, H), jnp.float32)
    hs = []
    for t in range(T):
        gates = x[:, t] @ w_ih.T + b_ih + h @ w_hh.T + b_hh
        i_g = jax.nn.sigmoid(gates[:, 0 * H:1 * H])
        f_g = jax.nn.sigmoid(gates[:, 1 * H:2 * H])
        g_g = jnp.tanh(gates[:, 2 * H:3 * H])
        o_g = jax.nn.sigmoid(gates[:, 3 * H:4 * H])
        c = f_g * c + i_g * g_g
        h = o_g * jnp.tanh(c)
        hs.append(h)
    out = jnp.stack(hs, axis=1).reshape(B, -1)         # (B, T*H)
    return out @ w_fc.T + b_fc


# ------------------------------- parameter init --------------------------------
def init_params(key, feat, hidden, seq, out):
    ks = jax.random.split(key, 6)
    k_lstm = 1.0 / np.sqrt(hidden)
    k_fc = 1.0 / np.sqrt(hidden * seq)
    w_ih = jax.random.uniform(ks[0], (4 * hidden, feat), jnp.float32, -k_lstm, k_lstm)
    w_hh = jax.random.uniform(ks[1], (4 * hidden, hidden), jnp.float32, -k_lstm, k_lstm)
    b_ih = jax.random.uniform(ks[2], (4 * hidden,), jnp.float32, -k_lstm, k_lstm)
    b_hh = jax.random.uniform(ks[3], (4 * hidden,), jnp.float32, -k_lstm, k_lstm)
    w_fc = jax.random.uniform(ks[4], (out, hidden * seq), jnp.float32, -k_fc, k_fc)
    b_fc = jax.random.uniform(ks[5], (out,), jnp.float32, -k_fc, k_fc)
    return (w_ih, w_hh, b_ih, b_hh, w_fc, b_fc)


if __name__ == "__main__":
    key = jax.random.PRNGKey(0)
    k_x, k_p = jax.random.split(key)
    x = jax.random.normal(k_x, (BATCH, SEQ, FEAT), jnp.float32)
    params = init_params(k_p, FEAT, HIDDEN, SEQ, OUT)

    y = lstm_combined_forward(x, params)
    y = jax.block_until_ready(y)

    y_ref = reference_forward(x, params)
    # Tolerance relaxed vs. the pure-f32 version because the recurrence
    # matmul now runs with explicit bf16 MXU operands (per perf review).
    np.testing.assert_allclose(np.asarray(y), np.asarray(y_ref), rtol=1e-2, atol=1e-2)

    print("KERNEL_OK")
</pallas_src>

<mosaic_0001>
module attributes {stable_mosaic.version = 11 : i64} {
  func.func @_lstm_fc_kernel(%arg0: memref<64x2xf32, #tpu.memory_space<vmem>>, %arg1: memref<2x128xf32, #tpu.memory_space<vmem>>, %arg2: memref<32x128xbf16, #tpu.memory_space<vmem>>, %arg3: memref<1x128xf32, #tpu.memory_space<vmem>>, %arg4: memref<256x128xf32, #tpu.memory_space<vmem>>, %arg5: memref<1x128xf32, #tpu.memory_space<vmem>>, %arg6: memref<8x128xf32, #tpu.memory_space<vmem>>) attributes {dimension_semantics = [], scalar_prefetch = 0 : i64, scratch_operands = 0 : i64, tpu.core_type = #tpu.core_type<tc>} {
    %c0 = arith.constant 0 : index
    %c0_0 = arith.constant 0 : index
    %0 = vector.load %arg0[%c0, %c0_0] : memref<64x2xf32, #tpu.memory_space<vmem>>, vector<64x2xf32>
    %c0_1 = arith.constant 0 : index
    %c0_2 = arith.constant 0 : index
    %1 = vector.load %arg1[%c0_1, %c0_2] : memref<2x128xf32, #tpu.memory_space<vmem>>, vector<2x128xf32>
    %c0_3 = arith.constant 0 : index
    %c0_4 = arith.constant 0 : index
    %2 = vector.load %arg2[%c0_3, %c0_4] : memref<32x128xbf16, #tpu.memory_space<vmem>>, vector<32x128xbf16>
    %c0_5 = arith.constant 0 : index
    %c0_6 = arith.constant 0 : index
    %3 = vector.load %arg3[%c0_5, %c0_6] : memref<1x128xf32, #tpu.memory_space<vmem>>, vector<1x128xf32>
    %4 = vector.shape_cast %3 : vector<1x128xf32> to vector<1x128xf32>
    %5 = vector.broadcast %4 : vector<1x128xf32> to vector<64x128xf32>
    %6 = vector.extract_strided_slice %0 {offsets = [0, 0], sizes = [64, 1], strides = [1, 1]} : vector<64x2xf32> to vector<64x1xf32>
    %7 = vector.extract_strided_slice %1 {offsets = [0, 0], sizes = [1, 128], strides = [1, 1]} : vector<2x128xf32> to vector<1x128xf32>
    %8 = vector.broadcast %6 : vector<64x1xf32> to vector<64x128xf32>
    %9 = vector.broadcast %7 : vector<1x128xf32> to vector<64x128xf32>
    %10 = arith.mulf %8, %9 : vector<64x128xf32>
    %11 = arith.addf %5, %10 : vector<64x128xf32>
    %12 = vector.extract_strided_slice %0 {offsets = [0, 1], sizes = [64, 1], strides = [1, 1]} : vector<64x2xf32> to vector<64x1xf32>
    %13 = vector.extract_strided_slice %1 {offsets = [1, 0], sizes = [1, 128], strides = [1, 1]} : vector<2x128xf32> to vector<1x128xf32>
    %14 = vector.broadcast %12 : vector<64x1xf32> to vector<64x128xf32>
    %15 = vector.broadcast %13 : vector<1x128xf32> to vector<64x128xf32>
    %16 = arith.mulf %14, %15 : vector<64x128xf32>
    %17 = arith.addf %11, %16 : vector<64x128xf32>
    %cst = arith.constant 0.000000e+00 : f32
    %18 = vector.broadcast %cst : f32 to vector<8x32xf32>
    %cst_7 = arith.constant 0.000000e+00 : f32
    %19 = vector.broadcast %cst_7 : f32 to vector<8x32xf32>
    %cst_8 = arith.constant 0.000000e+00 : f32
    %20 = vector.broadcast %cst_8 : f32 to vector<8x128xf32>
    %21 = vector.extract_strided_slice %17 {offsets = [0, 0], sizes = [8, 128], strides = [1, 1]} : vector<64x128xf32> to vector<8x128xf32>
    %22 = arith.truncf %18 : vector<8x32xf32> to vector<8x32xbf16>
    %cst_9 = arith.constant dense<0.000000e+00> : vector<8x128xf32>
    %23 = tpu.matmul %22, %2, %cst_9 {dimension_numbers = #tpu.dot_dimension_numbers<[1], [0], [0], [1], [0, 0, 1, 1], [], []>} : vector<8x32xbf16>, vector<32x128xbf16>, vector<8x128xf32> -> vector<8x128xf32>
    %24 = arith.addf %21, %23 : vector<8x128xf32>
    %25 = arith.negf %24 : vector<8x128xf32>
    %26 = math.exp %25 : vector<8x128xf32>
    %cst_10 = arith.constant 1.000000e+00 : f32
    %27 = vector.broadcast %cst_10 : f32 to vector<8x128xf32>
    %28 = arith.addf %27, %26 : vector<8x128xf32>
    %29 = arith.divf %27, %28 : vector<8x128xf32>
    %30 = math.tanh %24 : vector<8x128xf32>
    %31 = vector.extract_strided_slice %29 {offsets = [0, 0], sizes = [8, 32], strides = [1, 1]} : vector<8x128xf32> to vector<8x32xf32>
    %32 = vector.extract_strided_slice %29 {offsets = [0, 32], sizes = [8, 32], strides = [1, 1]} : vector<8x128xf32> to vector<8x32xf32>
    %33 = vector.extract_strided_slice %30 {offsets = [0, 64], sizes = [8, 32], strides = [1, 1]} : vector<8x128xf32> to vector<8x32xf32>
    %34 = vector.extract_strided_slice %29 {offsets = [0, 96], sizes = [8, 32], strides = [1, 1]} : vector<8x128xf32> to vector<8x32xf32>
    %35 = arith.mulf %32, %19 : vector<8x32xf32>
    %36 = arith.mulf %31, %33 : vector<8x32xf32>
    %37 = arith.addf %35, %36 : vector<8x32xf32>
    %38 = math.tanh %37 : vector<8x32xf32>
    %39 = arith.mulf %34, %38 : vector<8x32xf32>
    %c0_11 = arith.constant 0 : index
    %c0_12 = arith.constant 0 : index
    %40 = vector.load %arg4[%c0_11, %c0_12] : memref<256x128xf32, #tpu.memory_space<vmem>>, vector<32x128xf32>
    %cst_13 = arith.constant dense<0.000000e+00> : vector<8x128xf32>
    %41 = tpu.matmul %39, %40, %cst_13 {dimension_numbers = #tpu.dot_dimension_numbers<[1], [0], [0], [1], [0, 0, 1, 1], [], []>} : vector<8x32xf32>, vector<32x128xf32>, vector<8x128xf32> -> vector<8x128xf32>
    %42 = arith.addf %20, %41 : vector<8x128xf32>
    %43 = vector.extract_strided_slice %17 {offsets = [8, 0], sizes = [8, 128], strides = [1, 1]} : vector<64x128xf32> to vector<8x128xf32>
    %44 = arith.truncf %39 : vector<8x32xf32> to vector<8x32xbf16>
    %cst_14 = arith.constant dense<0.000000e+00> : vector<8x128xf32>
    %45 = tpu.matmul %44, %2, %cst_14 {dimension_numbers = #tpu.dot_dimension_numbers<[1], [0], [0], [1], [0, 0, 1, 1], [], []>} : vector<8x32xbf16>, vector<32x128xbf16>, vector<8x128xf32> -> vector<8x128xf32>
    %46 = arith.addf %43, %45 : vector<8x128xf32>
    %47 = arith.negf %46 : vector<8x128xf32>
    %48 = math.exp %47 : vector<8x128xf32>
    %cst_15 = arith.constant 1.000000e+00 : f32
    %49 = vector.broadcast %cst_15 : f32 to vector<8x128xf32>
    %50 = arith.addf %49, %48 : vector<8x128xf32>
    %51 = arith.divf %49, %50 : vector<8x128xf32>
    %52 = math.tanh %46 : vector<8x128xf32>
    %53 = vector.extract_strided_slice %51 {offsets = [0, 0], sizes = [8, 32], strides = [1, 1]} : vector<8x128xf32> to vector<8x32xf32>
    %54 = vector.extract_strided_slice %51 {offsets = [0, 32], sizes = [8, 32], strides = [1, 1]} : vector<8x128xf32> to vector<8x32xf32>
    %55 = vector.extract_strided_slice %52 {offsets = [0, 64], sizes = [8, 32], strides = [1, 1]} : vector<8x128xf32> to vector<8x32xf32>
    %56 = vector.extract_strided_slice %51 {offsets = [0, 96], sizes = [8, 32], strides = [1, 1]} : vector<8x128xf32> to vector<8x32xf32>
    %57 = arith.mulf %54, %37 : vector<8x32xf32>
    %58 = arith.mulf %53, %55 : vector<8x32xf32>
    %59 = arith.addf %57, %58 : vector<8x32xf32>
    %60 = math.tanh %59 : vector<8x32xf32>
    %61 = arith.mulf %56, %60 : vector<8x32xf32>
    %c32 = arith.constant 32 : index
    %c0_16 = arith.constant 0 : index
    %62 = vector.load %arg4[%c32, %c0_16] : memref<256x128xf32, #tpu.memory_space<vmem>>, vector<32x128xf32>
    %cst_17 = arith.constant dense<0.000000e+00> : vector<8x128xf32>
    %63 = tpu.matmul %61, %62, %cst_17 {dimension_numbers = #tpu.dot_dimension_numbers<[1], [0], [0], [1], [0, 0, 1, 1], [], []>} : vector<8x32xf32>, vector<32x128xf32>, vector<8x128xf32> -> vector<8x128xf32>
    %64 = arith.addf %42, %63 : vector<8x128xf32>
    %65 = vector.extract_strided_slice %17 {offsets = [16, 0], sizes = [8, 128], strides = [1, 1]} : vector<64x128xf32> to vector<8x128xf32>
    %66 = arith.truncf %61 : vector<8x32xf32> to vector<8x32xbf16>
    %cst_18 = arith.constant dense<0.000000e+00> : vector<8x128xf32>
    %67 = tpu.matmul %66, %2, %cst_18 {dimension_numbers = #tpu.dot_dimension_numbers<[1], [0], [0], [1], [0, 0, 1, 1], [], []>} : vector<8x32xbf16>, vector<32x128xbf16>, vector<8x128xf32> -> vector<8x128xf32>
    %68 = arith.addf %65, %67 : vector<8x128xf32>
    %69 = arith.negf %68 : vector<8x128xf32>
    %70 = math.exp %69 : vector<8x128xf32>
    %cst_19 = arith.constant 1.000000e+00 : f32
    %71 = vector.broadcast %cst_19 : f32 to vector<8x128xf32>
    %72 = arith.addf %71, %70 : vector<8x128xf32>
    %73 = arith.divf %71, %72 : vector<8x128xf32>
    %74 = math.tanh %68 : vector<8x128xf32>
    %75 = vector.extract_strided_slice %73 {offsets = [0, 0], sizes = [8, 32], strides = [1, 1]} : vector<8x128xf32> to vector<8x32xf32>
    %76 = vector.extract_strided_slice %73 {offsets = [0, 32], sizes = [8, 32], strides = [1, 1]} : vector<8x128xf32> to vector<8x32xf32>
    %77 = vector.extract_strided_slice %74 {offsets = [0, 64], sizes = [8, 32], strides = [1, 1]} : vector<8x128xf32> to vector<8x32xf32>
    %78 = vector.extract_strided_slice %73 {offsets = [0, 96], sizes = [8, 32], strides = [1, 1]} : vector<8x128xf32> to vector<8x32xf32>
    %79 = arith.mulf %76, %59 : vector<8x32xf32>
    %80 = arith.mulf %75, %77 : vector<8x32xf32>
    %81 = arith.addf %79, %80 : vector<8x32xf32>
    %82 = math.tanh %81 : vector<8x32xf32>
    %83 = arith.mulf %78, %82 : vector<8x32xf32>
    %c64 = arith.constant 64 : index
    %c0_20 = arith.constant 0 : index
    %84 = vector.load %arg4[%c64, %c0_20] : memref<256x128xf32, #tpu.memory_space<vmem>>, vector<32x128xf32>
    %cst_21 = arith.constant dense<0.000000e+00> : vector<8x128xf32>
    %85 = tpu.matmul %83, %84, %cst_21 {dimension_numbers = #tpu.dot_dimension_numbers<[1], [0], [0], [1], [0, 0, 1, 1], [], []>} : vector<8x32xf32>, vector<32x128xf32>, vector<8x128xf32> -> vector<8x128xf32>
    %86 = arith.addf %64, %85 : vector<8x128xf32>
    %87 = vector.extract_strided_slice %17 {offsets = [24, 0], sizes = [8, 128], strides = [1, 1]} : vector<64x128xf32> to vector<8x128xf32>
    %88 = arith.truncf %83 : vector<8x32xf32> to vector<8x32xbf16>
    %cst_22 = arith.constant dense<0.000000e+00> : vector<8x128xf32>
    %89 = tpu.matmul %88, %2, %cst_22 {dimension_numbers = #tpu.dot_dimension_numbers<[1], [0], [0], [1], [0, 0, 1, 1], [], []>} : vector<8x32xbf16>, vector<32x128xbf16>, vector<8x128xf32> -> vector<8x128xf32>
    %90 = arith.addf %87, %89 : vector<8x128xf32>
    %91 = arith.negf %90 : vector<8x128xf32>
    %92 = math.exp %91 : vector<8x128xf32>
    %cst_23 = arith.constant 1.000000e+00 : f32
    %93 = vector.broadcast %cst_23 : f32 to vector<8x128xf32>
    %94 = arith.addf %93, %92 : vector<8x128xf32>
    %95 = arith.divf %93, %94 : vector<8x128xf32>
    %96 = math.tanh %90 : vector<8x128xf32>
    %97 = vector.extract_strided_slice %95 {offsets = [0, 0], sizes = [8, 32], strides = [1, 1]} : vector<8x128xf32> to vector<8x32xf32>
    %98 = vector.extract_strided_slice %95 {offsets = [0, 32], sizes = [8, 32], strides = [1, 1]} : vector<8x128xf32> to vector<8x32xf32>
    %99 = vector.extract_strided_slice %96 {offsets = [0, 64], sizes = [8, 32], strides = [1, 1]} : vector<8x128xf32> to vector<8x32xf32>
    %100 = vector.extract_strided_slice %95 {offsets = [0, 96], sizes = [8, 32], strides = [1, 1]} : vector<8x128xf32> to vector<8x32xf32>
    %101 = arith.mulf %98, %81 : vector<8x32xf32>
    %102 = arith.mulf %97, %99 : vector<8x32xf32>
    %103 = arith.addf %101, %102 : vector<8x32xf32>
    %104 = math.tanh %103 : vector<8x32xf32>
    %105 = arith.mulf %100, %104 : vector<8x32xf32>
    %c96 = arith.constant 96 : index
    %c0_24 = arith.constant 0 : index
    %106 = vector.load %arg4[%c96, %c0_24] : memref<256x128xf32, #tpu.memory_space<vmem>>, vector<32x128xf32>
    %cst_25 = arith.constant dense<0.000000e+00> : vector<8x128xf32>
    %107 = tpu.matmul %105, %106, %cst_25 {dimension_numbers = #tpu.dot_dimension_numbers<[1], [0], [0], [1], [0, 0, 1, 1], [], []>} : vector<8x32xf32>, vector<32x128xf32>, vector<8x128xf32> -> vector<8x128xf32>
    %108 = arith.addf %86, %107 : vector<8x128xf32>
    %109 = vector.extract_strided_slice %17 {offsets = [32, 0], sizes = [8, 128], strides = [1, 1]} : vector<64x128xf32> to vector<8x128xf32>
    %110 = arith.truncf %105 : vector<8x32xf32> to vector<8x32xbf16>
    %cst_26 = arith.constant dense<0.000000e+00> : vector<8x128xf32>
    %111 = tpu.matmul %110, %2, %cst_26 {dimension_numbers = #tpu.dot_dimension_numbers<[1], [0], [0], [1], [0, 0, 1, 1], [], []>} : vector<8x32xbf16>, vector<32x128xbf16>, vector<8x128xf32> -> vector<8x128xf32>
    %112 = arith.addf %109, %111 : vector<8x128xf32>
    %113 = arith.negf %112 : vector<8x128xf32>
    %114 = math.exp %113 : vector<8x128xf32>
    %cst_27 = arith.constant 1.000000e+00 : f32
    %115 = vector.broadcast %cst_27 : f32 to vector<8x128xf32>
    %116 = arith.addf %115, %114 : vector<8x128xf32>
    %117 = arith.divf %115, %116 : vector<8x128xf32>
    %118 = math.tanh %112 : vector<8x128xf32>
    %119 = vector.extract_strided_slice %117 {offsets = [0, 0], sizes = [8, 32], strides = [1, 1]} : vector<8x128xf32> to vector<8x32xf32>
    %120 = vector.extract_strided_slice %117 {offsets = [0, 32], sizes = [8, 32], strides = [1, 1]} : vector<8x128xf32> to vector<8x32xf32>
    %121 = vector.extract_strided_slice %118 {offsets = [0, 64], sizes = [8, 32], strides = [1, 1]} : vector<8x128xf32> to vector<8x32xf32>
    %122 = vector.extract_strided_slice %117 {offsets = [0, 96], sizes = [8, 32], strides = [1, 1]} : vector<8x128xf32> to vector<8x32xf32>
    %123 = arith.mulf %120, %103 : vector<8x32xf32>
    %124 = arith.mulf %119, %121 : vector<8x32xf32>
    %125 = arith.addf %123, %124 : vector<8x32xf32>
    %126 = math.tanh %125 : vector<8x32xf32>
    %127 = arith.mulf %122, %126 : vector<8x32xf32>
    %c128 = arith.constant 128 : index
    %c0_28 = arith.constant 0 : index
    %128 = vector.load %arg4[%c128, %c0_28] : memref<256x128xf32, #tpu.memory_space<vmem>>, vector<32x128xf32>
    %cst_29 = arith.constant dense<0.000000e+00> : vector<8x128xf32>
    %129 = tpu.matmul %127, %128, %cst_29 {dimension_numbers = #tpu.dot_dimension_numbers<[1], [0], [0], [1], [0, 0, 1, 1], [], []>} : vector<8x32xf32>, vector<32x128xf32>, vector<8x128xf32> -> vector<8x128xf32>
    %130 = arith.addf %108, %129 : vector<8x128xf32>
    %131 = vector.extract_strided_slice %17 {offsets = [40, 0], sizes = [8, 128], strides = [1, 1]} : vector<64x128xf32> to vector<8x128xf32>
    %132 = arith.truncf %127 : vector<8x32xf32> to vector<8x32xbf16>
    %cst_30 = arith.constant dense<0.000000e+00> : vector<8x128xf32>
    %133 = tpu.matmul %132, %2, %cst_30 {dimension_numbers = #tpu.dot_dimension_numbers<[1], [0], [0], [1], [0, 0, 1, 1], [], []>} : vector<8x32xbf16>, vector<32x128xbf16>, vector<8x128xf32> -> vector<8x128xf32>
    %134 = arith.addf %131, %133 : vector<8x128xf32>
    %135 = arith.negf %134 : vector<8x128xf32>
    %136 = math.exp %135 : vector<8x128xf32>
    %cst_31 = arith.constant 1.000000e+00 : f32
    %137 = vector.broadcast %cst_31 : f32 to vector<8x128xf32>
    %138 = arith.addf %137, %136 : vector<8x128xf32>
    %139 = arith.divf %137, %138 : vector<8x128xf32>
    %140 = math.tanh %134 : vector<8x128xf32>
    %141 = vector.extract_strided_slice %139 {offsets = [0, 0], sizes = [8, 32], strides = [1, 1]} : vector<8x128xf32> to vector<8x32xf32>
    %142 = vector.extract_strided_slice %139 {offsets = [0, 32], sizes = [8, 32], strides = [1, 1]} : vector<8x128xf32> to vector<8x32xf32>
    %143 = vector.extract_strided_slice %140 {offsets = [0, 64], sizes = [8, 32], strides = [1, 1]} : vector<8x128xf32> to vector<8x32xf32>
    %144 = vector.extract_strided_slice %139 {offsets = [0, 96], sizes = [8, 32], strides = [1, 1]} : vector<8x128xf32> to vector<8x32xf32>
    %145 = arith.mulf %142, %125 : vector<8x32xf32>
    %146 = arith.mulf %141, %143 : vector<8x32xf32>
    %147 = arith.addf %145, %146 : vector<8x32xf32>
    %148 = math.tanh %147 : vector<8x32xf32>
    %149 = arith.mulf %144, %148 : vector<8x32xf32>
    %c160 = arith.constant 160 : index
    %c0_32 = arith.constant 0 : index
    %150 = vector.load %arg4[%c160, %c0_32] : memref<256x128xf32, #tpu.memory_space<vmem>>, vector<32x128xf32>
    %cst_33 = arith.constant dense<0.000000e+00> : vector<8x128xf32>
    %151 = tpu.matmul %149, %150, %cst_33 {dimension_numbers = #tpu.dot_dimension_numbers<[1], [0], [0], [1], [0, 0, 1, 1], [], []>} : vector<8x32xf32>, vector<32x128xf32>, vector<8x128xf32> -> vector<8x128xf32>
    %152 = arith.addf %130, %151 : vector<8x128xf32>
    %153 = vector.extract_strided_slice %17 {offsets = [48, 0], sizes = [8, 128], strides = [1, 1]} : vector<64x128xf32> to vector<8x128xf32>
    %154 = arith.truncf %149 : vector<8x32xf32> to vector<8x32xbf16>
    %cst_34 = arith.constant dense<0.000000e+00> : vector<8x128xf32>
    %155 = tpu.matmul %154, %2, %cst_34 {dimension_numbers = #tpu.dot_dimension_numbers<[1], [0], [0], [1], [0, 0, 1, 1], [], []>} : vector<8x32xbf16>, vector<32x128xbf16>, vector<8x128xf32> -> vector<8x128xf32>
    %156 = arith.addf %153, %155 : vector<8x128xf32>
    %157 = arith.negf %156 : vector<8x128xf32>
    %158 = math.exp %157 : vector<8x128xf32>
    %cst_35 = arith.constant 1.000000e+00 : f32
    %159 = vector.broadcast %cst_35 : f32 to vector<8x128xf32>
    %160 = arith.addf %159, %158 : vector<8x128xf32>
    %161 = arith.divf %159, %160 : vector<8x128xf32>
    %162 = math.tanh %156 : vector<8x128xf32>
    %163 = vector.extract_strided_slice %161 {offsets = [0, 0], sizes = [8, 32], strides = [1, 1]} : vector<8x128xf32> to vector<8x32xf32>
    %164 = vector.extract_strided_slice %161 {offsets = [0, 32], sizes = [8, 32], strides = [1, 1]} : vector<8x128xf32> to vector<8x32xf32>
    %165 = vector.extract_strided_slice %162 {offsets = [0, 64], sizes = [8, 32], strides = [1, 1]} : vector<8x128xf32> to vector<8x32xf32>
    %166 = vector.extract_strided_slice %161 {offsets = [0, 96], sizes = [8, 32], strides = [1, 1]} : vector<8x128xf32> to vector<8x32xf32>
    %167 = arith.mulf %164, %147 : vector<8x32xf32>
    %168 = arith.mulf %163, %165 : vector<8x32xf32>
    %169 = arith.addf %167, %168 : vector<8x32xf32>
    %170 = math.tanh %169 : vector<8x32xf32>
    %171 = arith.mulf %166, %170 : vector<8x32xf32>
    %c192 = arith.constant 192 : index
    %c0_36 = arith.constant 0 : index
    %172 = vector.load %arg4[%c192, %c0_36] : memref<256x128xf32, #tpu.memory_space<vmem>>, vector<32x128xf32>
    %cst_37 = arith.constant dense<0.000000e+00> : vector<8x128xf32>
    %173 = tpu.matmul %171, %172, %cst_37 {dimension_numbers = #tpu.dot_dimension_numbers<[1], [0], [0], [1], [0, 0, 1, 1], [], []>} : vector<8x32xf32>, vector<32x128xf32>, vector<8x128xf32> -> vector<8x128xf32>
    %174 = arith.addf %152, %173 : vector<8x128xf32>
    %175 = vector.extract_strided_slice %17 {offsets = [56, 0], sizes = [8, 128], strides = [1, 1]} : vector<64x128xf32> to vector<8x128xf32>
    %176 = arith.truncf %171 : vector<8x32xf32> to vector<8x32xbf16>
    %cst_38 = arith.constant dense<0.000000e+00> : vector<8x128xf32>
    %177 = tpu.matmul %176, %2, %cst_38 {dimension_numbers = #tpu.dot_dimension_numbers<[1], [0], [0], [1], [0, 0, 1, 1], [], []>} : vector<8x32xbf16>, vector<32x128xbf16>, vector<8x128xf32> -> vector<8x128xf32>
    %178 = arith.addf %175, %177 : vector<8x128xf32>
    %179 = arith.negf %178 : vector<8x128xf32>
    %180 = math.exp %179 : vector<8x128xf32>
    %cst_39 = arith.constant 1.000000e+00 : f32
    %181 = vector.broadcast %cst_39 : f32 to vector<8x128xf32>
    %182 = arith.addf %181, %180 : vector<8x128xf32>
    %183 = arith.divf %181, %182 : vector<8x128xf32>
    %184 = math.tanh %178 : vector<8x128xf32>
    %185 = vector.extract_strided_slice %183 {offsets = [0, 0], sizes = [8, 32], strides = [1, 1]} : vector<8x128xf32> to vector<8x32xf32>
    %186 = vector.extract_strided_slice %183 {offsets = [0, 32], sizes = [8, 32], strides = [1, 1]} : vector<8x128xf32> to vector<8x32xf32>
    %187 = vector.extract_strided_slice %184 {offsets = [0, 64], sizes = [8, 32], strides = [1, 1]} : vector<8x128xf32> to vector<8x32xf32>
    %188 = vector.extract_strided_slice %183 {offsets = [0, 96], sizes = [8, 32], strides = [1, 1]} : vector<8x128xf32> to vector<8x32xf32>
    %189 = arith.mulf %186, %169 : vector<8x32xf32>
    %190 = arith.mulf %185, %187 : vector<8x32xf32>
    %191 = arith.addf %189, %190 : vector<8x32xf32>
    %192 = math.tanh %191 : vector<8x32xf32>
    %193 = arith.mulf %188, %192 : vector<8x32xf32>
    %c224 = arith.constant 224 : index
    %c0_40 = arith.constant 0 : index
    %194 = vector.load %arg4[%c224, %c0_40] : memref<256x128xf32, #tpu.memory_space<vmem>>, vector<32x128xf32>
    %cst_41 = arith.constant dense<0.000000e+00> : vector<8x128xf32>
    %195 = tpu.matmul %193, %194, %cst_41 {dimension_numbers = #tpu.dot_dimension_numbers<[1], [0], [0], [1], [0, 0, 1, 1], [], []>} : vector<8x32xf32>, vector<32x128xf32>, vector<8x128xf32> -> vector<8x128xf32>
    %196 = arith.addf %174, %195 : vector<8x128xf32>
    %c0_42 = arith.constant 0 : index
    %c0_43 = arith.constant 0 : index
    %197 = vector.load %arg5[%c0_42, %c0_43] : memref<1x128xf32, #tpu.memory_space<vmem>>, vector<1x128xf32>
    %198 = vector.broadcast %197 : vector<1x128xf32> to vector<8x128xf32>
    %199 = arith.addf %196, %198 : vector<8x128xf32>
    %c0_44 = arith.constant 0 : index
    %c0_45 = arith.constant 0 : index
    %200 = vector.load %arg6[%c0_44, %c0_45] : memref<8x128xf32, #tpu.memory_space<vmem>>, vector<8x128xf32>
    tpu.vector_store %arg6[%c0_44, %c0_45], %199 {strides = array<i32>} : memref<8x128xf32, #tpu.memory_space<vmem>>, vector<8x128xf32>,
    return
  }
}

</mosaic_0001>

<bundles_post_ra>
// kernel: tpu_custom_call.1
= control target key start
LH: loop header
LB: loop body
LE: loop exit
PB: predicated region body
PF: predicated region fallthrough
CT: control target
= control target key end

     0   :  { %11 = vsyncpa [#allocation3], 0  ;;  %s2123_s0 = inlined_call_operand.vmem [shape: f32[64,2], index: 0, kind: input, shape index: {}]   ;;  %s2124_s1 = inlined_call_operand.vmem [shape: f32[2,128], index: 1, kind: input, shape index: {}]   ;;  %s2125_s2 = inlined_call_operand.vmem [shape: bf16[32,128], index: 2, kind: input, shape index: {}]   ;;  %s2126_s3 = inlined_call_operand.vmem [shape: f32[1,128], index: 3, kind: input, shape index: {}]   ;;  %s2127_s4 = inlined_call_operand.hbm [shape: f32[256,128], index: 4, kind: input, shape index: {}]   ;;  %s2128_s5 = inlined_call_operand.vmem [shape: f32[1,128], index: 5, kind: input, shape index: {}]   ;;  %s2129_s6 = inlined_call_operand.hbm [shape: f32[8,128], index: 6, kind: output, shape index: {}]  }
   0x1   :  { %12 = vsyncpa [#allocation4], 0  ;;  %s1796_s21 = smov [#allocation2]  }
   0x2   :  { %s26_s22 = sshll.u32 %s1796_s21, 4  ;;  %s27_s22 = int_to_ptr.vmem [resolvable:$true] %s26_s22 }
   0x3   :  { %s1760_s23 = scalar_lea.vmem %s27_s22, 4096  ;;  %p1765_p1 = scmp.lt.s32.totalorder %s27_s22, %s27_s22 }
   0x4   :  { %p1761_p0 = scmp.ne.s32.totalorder %s27_s22, %s1760_s23  ;;  %p1766_p2 = scmp.lt.s32.totalorder %s1760_s23, %s1760_s23 }
   0x6   :  { %p1767_p3 = por %p1766_p2, %p1765_p1 }
   0x8   :  { %p1768_p4 = pnand %p1767_p3, %p1761_p0 }
   0xa   :  { %1771 = shalt.err (!%p1768_p4)
}
   0xb   :  { %s1797_s24 = smov 128   ;;  %s1798_s25 = smov 8  }
   0xc   :  { %32 = dma.hbm_to_vmem [thread:$0]  %s2127_s4, 4096, %s27_s22, [#allocation3], %s1797_s24, %s1797_s24, %s1798_s25  }
   0xd   :  { %1792 = dma.done.wait [#allocation3], 4096  }
   0xe   :  { %1793 = vsyncadd [#allocation3], 4294963200  ;;  %v1799_v0 = vmov 0.0   ;;  %vm1800_vm0 = vmmov 0   ;;  %v1801_v1 = vmov 0   ;;  %v1855_v2 = vld [vmem:[%s2125_s2 + $0x8] sm:$0xff]   ;;  %v99_v6 = vlaneseq }
   0xf   :  { %1509 = vmatprep.subr.bf16.mxu0 %v1799_v0  ;;  %1513 = vmatprep.mubr.msk.bf16.mxu0 %vm1800_vm0, %v1799_v0  ;;  %v1861_v3 = vld [vmem:[%s2125_s2] sm:$0xff]   ;;  %v1802_v5 = vmov 1   ;;  %v40_v36 = vld [vmem:[%s2123_s0 + $0x8] sm:$0xff]  ;;  %vm183_vm1 = vcmask 261120   ;;  %v331_v62 = vld [vmem:[#allocation2 + $0x38] sm:$0xff]  ;;  %s1805_s27 = smov [#allocation5]  }
  0x10   :  { %1671 = vset.pattern.permute.xlu0 %v1801_v1  ;;  %1673 = vset.pattern.permute.xlu1 %v1801_v1  ;;  %v39_v4 = vld [vmem:[%s2123_s0] sm:$0xff]  ;;  %v100_v7 = vshrl.u32 %v99_v6, 7  ;;  %v330_v63 = vld [vmem:[#allocation2 + $0x30] sm:$0xff]  ;;  %s1409_s4 = sshll.u32 %s1805_s27, 4  ;;  %s1410_s4 = int_to_ptr.vmem [resolvable:$true] %s1409_s4 }
  0x11   :  { %1517 = vmatprep.subr.bf16.mxu1 %v1799_v0  ;;  %1521 = vmatprep.mubr.msk.bf16.mxu1 %vm1800_vm0, %v1799_v0  ;;  %v47_v9 = vld [vmem:[%s2124_s1] sm:$0x3]  ;;  %s1803_s1 = smov 64   ;;  %s1772_s28 = scalar_lea.vmem %s1410_s4, 128 }
  0x12   :  { %1510 = vmatpush3.bf16.msra.mxu0 %v1855_v2  ;;  %1518 = vmatpush3.bf16.msra.mxu1 %v1855_v2  ;;  %v101_v8 = vsub.s32 0, %v100_v7  ;;  %v153_v12 = vsub.s32 1, %v100_v7  ;;  %v1888_v15 = vld [vmem:[%s2126_s3] ss:$0 sm:$0xff]  ;;  %s1804_s3 = smov 32   ;;  %p1773_p5 = scmp.ne.s32.totalorder %s1410_s4, %s1772_s28 }
  0x13   :  { %1511 = vmatprep.subr.bf16.mxu0 %v1799_v0  ;;  %61 = vperm.xlu0 %1671, %v39_v4   ;;  %v328_v6 = vld [vmem:[#allocation2 + $0x20] sm:$0xff]  ;;  %p1777_p6 = scmp.lt.s32.totalorder %s1410_s4, %s1410_s4  ;;  %p1778_p7 = scmp.lt.s32.totalorder %s1772_s28, %s1772_s28 }
  0x14   :  { %1519 = vmatprep.subr.bf16.mxu1 %v1799_v0  ;;  %v1880_v11 = vrot.slane %v47_v9, %v101_v8  ;;  %v1883_v14 = vrot.slane %v47_v9, %v153_v12  ;;  %v41_v12 = vld [vmem:[%s2123_s0 + $0x10] sm:$0xff] }
  0x15   :  { %p1779_p8 = por %p1778_p7, %p1777_p6 }
  0x16   :  { %1512 = vmatpush3.bf16.msra.mxu0 %v1861_v3  ;;  %1520 = vmatpush3.bf16.msra.mxu1 %v1861_v3 }
  0x17   :  { %1672 = vset.pattern.permute.xlu0 %v1802_v5  ;;  %1525 = vmatprep.subr.mxu0 %v1799_v0  ;;  %p1780_p9 = pnand %p1779_p8, %p1773_p5 }
  0x18   :  { %120 = vperm.xlu0 %1672, %v39_v4   ;;  %1536 = vmatprep.subr.mxu1 %v1799_v0  ;;  %v329_v4 = vld [vmem:[#allocation2 + $0x28] sm:$0xff] }
  0x19   :  { %1514 = vmatmul.mubr.bf16.vlgmr.msra.gmra.mxu0 %v1801_v1 }
  0x1a   :  { %1533 = vmatprep.mubr.msk.f32.mxu0 %vm1800_vm0, %v1799_v0  ;;  %1526 = vmatpush3.msra.mxu0 %v331_v62 }
  0x1b   :  { %1527 = vmatprep.subr.mxu0 %v1799_v0 }
  0x1c   :  { %1528 = vmatpush3.msra.mxu0 %v330_v63 }
  0x1d   :  { %1529 = vmatprep.subr.mxu0 %v1799_v0 }
  0x1e   :  { %1530 = vmatpush3.msra.mxu0 %v329_v4 }
  0x1f   :  { %1531 = vmatprep.subr.mxu0 %v1799_v0 }
  0x20   :  { %1532 = vmatpush3.msra.mxu0 %v328_v6 }
  0x21   :  { %1547 = vmatprep.subr.bf16.mxu0 %v1799_v0 }
  0x8e   :  { %v62_v10 = vpop.permute.xlu0 %61 }
  0x8f   :  { %v103_v13 = vmul.f32 %v1880_v11, %v62_v10 }
  0x91   :  { %v111_v17 = vadd.f32 %v1888_v15, %v103_v13 }
  0x93   :  { %v121_v16 = vpop.permute.xlu0 %120 }
  0x94   :  { %v155_v18 = vmul.f32 %v1883_v14, %v121_v16 }
  0x96   :  { %v163_v19 = vadd.f32 %v155_v18, %v111_v17 }
  0xd9   :  { %v221_v20 = vpop.f32.mrf.mxu0 }
  0xda   :  { %v227_v21 = vadd.f32 %v221_v20, %v163_v19 }
  0xdb   :  { %v1515_v22 = vpop.f32.mrf.mxu0 }
  0xdc   :  { %1688 = vtanh.f32 %v227_v21  ;;  %v1421_v26 = vmul.f32 -1.442695, %v227_v21 }
  0xdd   :  { %v224_v23 = vpop.f32.mrf.mxu0 }
  0xde   :  { %1690 = vpow2.f32 %v1421_v26 }
  0xdf   :  { %v1516_v24 = vpop.f32.mrf.mxu0 }
  0xe9   :  { %v1689_v25 = vpop.eup %1688 }
  0xea   :  { %237 = vrot.lane.b32.xlu1 %v1689_v25, %s1803_s1 }
  0xeb   :  { %v1691_v27 = vpop.eup %1690 }
  0xec   :  { %v231_v28 = vadd.f32 1.0, %v1691_v27 }
  0xee   :  { %1692 = vrcp.f32 %v231_v28 }
  0xfb   :  { %v1693_v29 = vpop.eup %1692 }
  0xfc   :  { %v235_v32 = vmul.f32 0.0, %v1693_v29 }
 0x15c   :  { %v238_v30 = vpop.permute.xlu1 %237 }
 0x15d   :  { %v240_v31 = vmul.f32 %v1693_v29, %v238_v30 }
 0x15f   :  { %242 = vrot.lane.b32.xlu1 %v240_v31, %s1804_s3 }
 0x1d1   :  { %v243_v33 = vpop.permute.xlu1 %242 }
 0x1d2   :  { %v245_v34 = vadd.f32 %v243_v33, %v235_v32 }
 0x1d4   :  { %1694 = vtanh.f32 %v245_v34 }
 0x1e1   :  { %v1695_v35 = vpop.eup %1694 }
 0x1e2   :  { %248 = vrot.lane.b32.xlu1 %v1695_v35, %s1803_s1 }
 0x1e6   :  { %66 = vperm.xlu1 %1673, %v40_v36  }
 0x1ea   :  { %1675 = vset.pattern.permute.xlu1 %v1802_v5 }
 0x254   :  { %v249_v37 = vpop.permute.xlu1 %248 }
 0x255   :  { %v1899_v38 = vmul.f32 %v1693_v29, %v249_v37 }
 0x257   :  { %v256_v39 = vpack.c.bf16 %v1899_v38, %v1899_v38 }
 0x259   :  { %258 = vrot.lane.b32.xlu0 %v256_v39, %s1804_s3 }
 0x25d   :  { %124 = vperm.xlu0 %1672, %v40_v36  }
 0x261   :  { %1674 = vset.pattern.permute.xlu0 %v1801_v1  ;;  %v67_v41 = vpop.permute.xlu1 %66 }
 0x262   :  { %v104_v42 = vmul.f32 %v1880_v11, %v67_v41 }
 0x264   :  { %v112_v44 = vadd.f32 %v1888_v15, %v104_v42  ;;  %v42_v42 = vld [vmem:[%s2123_s0 + $0x18] sm:$0xff] }
 0x2cb   :  { %v259_v40 = vpop.permute.xlu0 %258 }
 0x2cc   :  { %1522 = vmatmul.mubr.msk.bf16.vlgmr.msra.gmra.mxu1 %vm183_vm1, %v259_v40 }
 0x2cd   :  { %1544 = vmatprep.mubr.msk.f32.mxu1 %vm1800_vm0, %v1799_v0 }
 0x2d8   :  { %v125_v43 = vpop.permute.xlu0 %124 }
 0x2d9   :  { %v156_v45 = vmul.f32 %v1883_v14, %v125_v43 }
 0x2db   :  { %v164_v46 = vadd.f32 %v156_v45, %v112_v44 }
 0x38c   :  { %v297_v47 = vpop.f32.mrf.mxu1 }
 0x38d   :  { %v303_v48 = vadd.f32 %v297_v47, %v164_v46 }
 0x38e   :  { %v1523_v49 = vpop.f32.mrf.mxu1 }
 0x38f   :  { %1696 = vtanh.f32 %v303_v48  ;;  %v1423_v53 = vmul.f32 -1.442695, %v303_v48 }
 0x390   :  { %v300_v50 = vpop.f32.mrf.mxu1 }
 0x391   :  { %1698 = vpow2.f32 %v1423_v53 }
 0x392   :  { %v1524_v51 = vpop.f32.mrf.mxu1 }
 0x39c   :  { %v1697_v52 = vpop.eup %1696 }
 0x39d   :  { %313 = vrot.lane.b32.xlu1 %v1697_v52, %s1803_s1 }
 0x39e   :  { %v1699_v54 = vpop.eup %1698 }
 0x39f   :  { %v307_v55 = vadd.f32 1.0, %v1699_v54 }
 0x3a1   :  { %1700 = vrcp.f32 %v307_v55 }
 0x3ae   :  { %v1701_v56 = vpop.eup %1700 }
 0x3af   :  { %v311_v59 = vmul.f32 %v1701_v56, %v245_v34 }
 0x40f   :  { %v314_v57 = vpop.permute.xlu1 %313 }
 0x410   :  { %v316_v58 = vmul.f32 %v1701_v56, %v314_v57 }
 0x412   :  { %318 = vrot.lane.b32.xlu0 %v316_v58, %s1804_s3 }
 0x484   :  { %v319_v60 = vpop.permute.xlu0 %318 }
 0x485   :  { %v1913_v61 = vadd.f32 %v319_v60, %v311_v59 }
 0x487   :  { %1702 = vtanh.f32 %v1913_v61 }
 0x494   :  { %v1703_v7 = vpop.eup %1702 }
 0x495   :  { %324 = vrot.lane.b32.xlu1 %v1703_v7, %s1803_s1 }
 0x507   :  { %v325_v8 = vpop.permute.xlu1 %324 }
 0x508   :  { %v327_v9 = vmul.f32 %v1701_v56, %v325_v8 }
 0x50a   :  { %v482_v10 = vpack.c.bf16 %v327_v9, %v327_v9  ;;  %333 = vrot.lane.b32.xlu0 %v327_v9, %s1804_s3 }
 0x50c   :  { %484 = vrot.lane.b32.xlu1 %v482_v10, %s1804_s3  ;;  %v43_v10 = vld [vmem:[%s2123_s0 + $0x20] sm:$0xff] }
 0x50e   :  { %71 = vperm.xlu0 %1674, %v41_v12  }
 0x510   :  { %128 = vperm.xlu1 %1675, %v41_v12  }
 0x512   :  { %1677 = vset.pattern.permute.xlu0 %v1802_v5 }
 0x514   :  { %1676 = vset.pattern.permute.xlu1 %v1801_v1 }
 0x57c   :  { %v334_v13 = vpop.permute.xlu0 %333 }
 0x57d   :  { %1534 = vmatmul.mubr.msk.f32.vlgmr.msra.gmra.mxu0 %vm183_vm1, %v334_v13 }
 0x57e   :  { %1548 = vmatpush3.bf16.msra.mxu0 %v1855_v2  ;;  %1551 = vmatprep.mubr.msk.bf16.mxu0 %vm1800_vm0, %v1799_v0  ;;  %v485_v16 = vpop.permute.xlu1 %484 }
 0x57f   :  { %1549 = vmatprep.subr.bf16.mxu0 %v1799_v0 }
 0x582   :  { %1550 = vmatpush3.bf16.msra.mxu0 %v1861_v3 }
 0x583   :  { %1566 = vmatprep.subr.bf16.mxu0 %v1799_v0 }
 0x585   :  { %1552 = vmatmul.mubr.msk.bf16.vlgmr.msra.gmra.mxu0 %vm183_vm1, %v485_v16 }
 0x586   :  { %1567 = vmatpush3.bf16.msra.mxu0 %v1855_v2  ;;  %1570 = vmatprep.mubr.msk.bf16.mxu0 %vm1800_vm0, %v1799_v0 }
 0x587   :  { %1568 = vmatprep.subr.bf16.mxu0 %v1799_v0 }
 0x589   :  { %v72_v17 = vpop.permute.xlu0 %71 }
 0x58a   :  { %1569 = vmatpush3.bf16.msra.mxu0 %v1861_v3  ;;  %v105_v18 = vmul.f32 %v1880_v11, %v72_v17 }
 0x58b   :  { %1585 = vmatprep.subr.bf16.mxu0 %v1799_v0  ;;  %v129_v19 = vpop.permute.xlu1 %128 }
 0x58c   :  { %v113_v21 = vadd.f32 %v1888_v15, %v105_v18  ;;  %v157_v22 = vmul.f32 %v1883_v14, %v129_v19 }
 0x58e   :  { %v165_v24 = vadd.f32 %v157_v22, %v113_v21 }
 0x63d   :  { %v1943_v20 = vpop.f32.mrf.mxu0 }
 0x63f   :  { %v1535_v23 = vpop.f32.mrf.mxu0 }
 0x645   :  { %v523_v25 = vpop.f32.mrf.mxu0 }
 0x646   :  { %v529_v26 = vadd.f32 %v523_v25, %v165_v24 }
 0x647   :  { %v1553_v27 = vpop.f32.mrf.mxu0 }
 0x648   :  { %1704 = vtanh.f32 %v529_v26  ;;  %v1427_v31 = vmul.f32 -1.442695, %v529_v26 }
 0x649   :  { %v526_v28 = vpop.f32.mrf.mxu0 }
 0x64a   :  { %1706 = vpow2.f32 %v1427_v31 }
 0x64b   :  { %v1554_v29 = vpop.f32.mrf.mxu0 }
 0x655   :  { %v1705_v30 = vpop.eup %1704 }
 0x656   :  { %539 = vrot.lane.b32.xlu1 %v1705_v30, %s1803_s1 }
 0x657   :  { %v1707_v32 = vpop.eup %1706 }
 0x658   :  { %v533_v33 = vadd.f32 1.0, %v1707_v32 }
 0x65a   :  { %1708 = vrcp.f32 %v533_v33 }
 0x667   :  { %v1709_v34 = vpop.eup %1708 }
 0x668   :  { %v537_v37 = vmul.f32 %v1709_v34, %v1913_v61 }
 0x6c8   :  { %v540_v35 = vpop.permute.xlu1 %539 }
 0x6c9   :  { %v542_v36 = vmul.f32 %v1709_v34, %v540_v35 }
 0x6cb   :  { %544 = vrot.lane.b32.xlu0 %v542_v36, %s1804_s3 }
 0x73d   :  { %v545_v39 = vpop.permute.xlu0 %544 }
 0x73e   :  { %v547_v40 = vadd.f32 %v545_v39, %v537_v37 }
 0x740   :  { %1710 = vtanh.f32 %v547_v40 }
 0x74d   :  { %v1711_v41 = vpop.eup %1710 }
 0x74e   :  { %550 = vrot.lane.b32.xlu1 %v1711_v41, %s1803_s1 }
 0x752   :  { %76 = vperm.xlu1 %1676, %v42_v42  }
 0x756   :  { %1679 = vset.pattern.permute.xlu1 %v1802_v5 }
 0x7c0   :  { %v551_v43 = vpop.permute.xlu1 %550 }
 0x7c1   :  { %v1955_v44 = vmul.f32 %v1709_v34, %v551_v43 }
 0x7c3   :  { %v634_v45 = vpack.c.bf16 %v1955_v44, %v1955_v44 }
 0x7c5   :  { %636 = vrot.lane.b32.xlu0 %v634_v45, %s1804_s3 }
 0x7c9   :  { %132 = vperm.xlu0 %1677, %v42_v42   ;;  %v44_v42 = vld [vmem:[%s2123_s0 + $0x28] sm:$0xff] }
 0x7cd   :  { %1678 = vset.pattern.permute.xlu0 %v1801_v1  ;;  %v77_v47 = vpop.permute.xlu1 %76 }
 0x7ce   :  { %v106_v48 = vmul.f32 %v1880_v11, %v77_v47 }
 0x7d0   :  { %v114_v50 = vadd.f32 %v1888_v15, %v106_v48 }
 0x837   :  { %v637_v46 = vpop.permute.xlu0 %636 }
 0x838   :  { %1571 = vmatmul.mubr.msk.bf16.vlgmr.msra.gmra.mxu0 %vm183_vm1, %v637_v46 }
 0x839   :  { %1586 = vmatpush3.bf16.msra.mxu0 %v1855_v2  ;;  %1589 = vmatprep.mubr.msk.bf16.mxu0 %vm1800_vm0, %v1799_v0 }
 0x83a   :  { %1587 = vmatprep.subr.bf16.mxu0 %v1799_v0 }
 0x83d   :  { %1588 = vmatpush3.bf16.msra.mxu0 %v1861_v3 }
 0x83e   :  { %1604 = vmatprep.subr.bf16.mxu0 %v1799_v0 }
 0x844   :  { %v133_v49 = vpop.permute.xlu0 %132 }
 0x845   :  { %v158_v51 = vmul.f32 %v1883_v14, %v133_v49 }
 0x847   :  { %v166_v52 = vadd.f32 %v158_v51, %v114_v50 }
 0x8f8   :  { %v675_v53 = vpop.f32.mrf.mxu0 }
 0x8f9   :  { %v681_v54 = vadd.f32 %v675_v53, %v166_v52 }
 0x8fa   :  { %v1572_v55 = vpop.f32.mrf.mxu0 }
 0x8fb   :  { %1712 = vtanh.f32 %v681_v54  ;;  %v1430_v59 = vmul.f32 -1.442695, %v681_v54 }
 0x8fc   :  { %v678_v56 = vpop.f32.mrf.mxu0 }
 0x8fd   :  { %1714 = vpow2.f32 %v1430_v59 }
 0x8fe   :  { %v1573_v57 = vpop.f32.mrf.mxu0 }
 0x908   :  { %v1713_v58 = vpop.eup %1712 }
 0x909   :  { %691 = vrot.lane.b32.xlu1 %v1713_v58, %s1803_s1 }
 0x90a   :  { %v1715_v60 = vpop.eup %1714 }
 0x90b   :  { %v685_v61 = vadd.f32 1.0, %v1715_v60 }
 0x90d   :  { %1716 = vrcp.f32 %v685_v61 }
 0x91a   :  { %v1717_v62 = vpop.eup %1716 }
 0x91b   :  { %v689_v6 = vmul.f32 %v1717_v62, %v547_v40 }
 0x97b   :  { %v692_v63 = vpop.permute.xlu1 %691 }
 0x97c   :  { %v694_v4 = vmul.f32 %v1717_v62, %v692_v63 }
 0x97e   :  { %696 = vrot.lane.b32.xlu1 %v694_v4, %s1804_s3 }
 0x9f0   :  { %v697_v7 = vpop.permute.xlu1 %696 }
 0x9f1   :  { %v699_v8 = vadd.f32 %v697_v7, %v689_v6 }
 0x9f3   :  { %1718 = vtanh.f32 %v699_v8 }
 0xa00   :  { %v1719_v9 = vpop.eup %1718 }
 0xa01   :  { %702 = vrot.lane.b32.xlu0 %v1719_v9, %s1803_s1 }
 0xa05   :  { %81 = vperm.xlu0 %1678, %v43_v10  }
 0xa09   :  { %1681 = vset.pattern.permute.xlu0 %v1802_v5 }
 0xa73   :  { %v703_v12 = vpop.permute.xlu0 %702 }
 0xa74   :  { %v1978_v13 = vmul.f32 %v1717_v62, %v703_v12  ;;  %v45_v12 = vld [vmem:[%s2123_s0 + $0x30] sm:$0xff] }
 0xa76   :  { %v786_v16 = vpack.c.bf16 %v1978_v13, %v1978_v13 }
 0xa78   :  { %788 = vrot.lane.b32.xlu1 %v786_v16, %s1804_s3 }
 0xa7c   :  { %136 = vperm.xlu1 %1679, %v43_v10  }
 0xa80   :  { %1680 = vset.pattern.permute.xlu1 %v1801_v1  ;;  %v82_v18 = vpop.permute.xlu0 %81 }
 0xa81   :  { %v107_v19 = vmul.f32 %v1880_v11, %v82_v18 }
 0xa83   :  { %v115_v22 = vadd.f32 %v1888_v15, %v107_v19 }
 0xaea   :  { %v789_v17 = vpop.permute.xlu1 %788 }
 0xaeb   :  { %1590 = vmatmul.mubr.msk.bf16.vlgmr.msra.gmra.mxu0 %vm183_vm1, %v789_v17 }
 0xaec   :  { %1605 = vmatpush3.bf16.msra.mxu0 %v1855_v2  ;;  %1608 = vmatprep.mubr.msk.bf16.mxu0 %vm1800_vm0, %v1799_v0 }
 0xaed   :  { %1606 = vmatprep.subr.bf16.mxu0 %v1799_v0 }
 0xaf0   :  { %1607 = vmatpush3.bf16.msra.mxu0 %v1861_v3 }
 0xaf1   :  { %1623 = vmatprep.subr.bf16.mxu0 %v1799_v0 }
 0xaf7   :  { %v137_v21 = vpop.permute.xlu1 %136 }
 0xaf8   :  { %v159_v23 = vmul.f32 %v1883_v14, %v137_v21 }
 0xafa   :  { %v167_v24 = vadd.f32 %v159_v23, %v115_v22 }
 0xbab   :  { %v827_v25 = vpop.f32.mrf.mxu0 }
 0xbac   :  { %v833_v26 = vadd.f32 %v827_v25, %v167_v24 }
 0xbad   :  { %v1591_v27 = vpop.f32.mrf.mxu0 }
 0xbae   :  { %1720 = vtanh.f32 %v833_v26  ;;  %v1433_v31 = vmul.f32 -1.442695, %v833_v26 }
 0xbaf   :  { %v830_v28 = vpop.f32.mrf.mxu0 }
 0xbb0   :  { %1722 = vpow2.f32 %v1433_v31 }
 0xbb1   :  { %v1592_v29 = vpop.f32.mrf.mxu0 }
 0xbbb   :  { %v1721_v30 = vpop.eup %1720 }
 0xbbc   :  { %843 = vrot.lane.b32.xlu1 %v1721_v30, %s1803_s1 }
 0xbbd   :  { %v1723_v32 = vpop.eup %1722 }
 0xbbe   :  { %v837_v33 = vadd.f32 1.0, %v1723_v32 }
 0xbc0   :  { %1724 = vrcp.f32 %v837_v33 }
 0xbcd   :  { %v1725_v34 = vpop.eup %1724 }
 0xbce   :  { %v841_v37 = vmul.f32 %v1725_v34, %v699_v8 }
 0xc2e   :  { %v844_v35 = vpop.permute.xlu1 %843 }
 0xc2f   :  { %v846_v36 = vmul.f32 %v1725_v34, %v844_v35 }
 0xc31   :  { %848 = vrot.lane.b32.xlu0 %v846_v36, %s1804_s3 }
 0xca3   :  { %v849_v39 = vpop.permute.xlu0 %848 }
 0xca4   :  { %v851_v40 = vadd.f32 %v849_v39, %v841_v37 }
 0xca6   :  { %1726 = vtanh.f32 %v851_v40 }
 0xcb3   :  { %v1727_v41 = vpop.eup %1726 }
 0xcb4   :  { %854 = vrot.lane.b32.xlu1 %v1727_v41, %s1803_s1 }
 0xcb8   :  { %86 = vperm.xlu1 %1680, %v44_v42  }
 0xcbc   :  { %1683 = vset.pattern.permute.xlu1 %v1802_v5 }
 0xd26   :  { %v855_v43 = vpop.permute.xlu1 %854 }
 0xd27   :  { %v2001_v45 = vmul.f32 %v1725_v34, %v855_v43 }
 0xd29   :  { %v938_v46 = vpack.c.bf16 %v2001_v45, %v2001_v45 }
 0xd2b   :  { %940 = vrot.lane.b32.xlu0 %v938_v46, %s1804_s3 }
 0xd2f   :  { %140 = vperm.xlu0 %1681, %v44_v42  }
 0xd33   :  { %1682 = vset.pattern.permute.xlu0 %v1801_v1  ;;  %v87_v48 = vpop.permute.xlu1 %86 }
 0xd34   :  { %v108_v49 = vmul.f32 %v1880_v11, %v87_v48 }
 0xd36   :  { %v116_v51 = vadd.f32 %v1888_v15, %v108_v49 }
 0xd9d   :  { %v941_v47 = vpop.permute.xlu0 %940 }
 0xd9e   :  { %1609 = vmatmul.mubr.msk.bf16.vlgmr.msra.gmra.mxu0 %vm183_vm1, %v941_v47 }
 0xd9f   :  { %1624 = vmatpush3.bf16.msra.mxu0 %v1855_v2  ;;  %1627 = vmatprep.mubr.msk.bf16.mxu0 %vm1800_vm0, %v1799_v0 }
 0xda0   :  { %1625 = vmatprep.subr.bf16.mxu0 %v1799_v0 }
 0xda3   :  { %1626 = vmatpush3.bf16.msra.mxu0 %v1861_v3 }
 0xda4   :  { %1642 = vmatprep.subr.bf16.mxu0 %v1799_v0 }
 0xdaa   :  { %v141_v50 = vpop.permute.xlu0 %140 }
 0xdab   :  { %v160_v52 = vmul.f32 %v1883_v14, %v141_v50 }
 0xdad   :  { %v168_v53 = vadd.f32 %v160_v52, %v116_v51 }
 0xe5e   :  { %v979_v54 = vpop.f32.mrf.mxu0 }
 0xe5f   :  { %v985_v55 = vadd.f32 %v979_v54, %v168_v53 }
 0xe60   :  { %v1610_v56 = vpop.f32.mrf.mxu0 }
 0xe61   :  { %1728 = vtanh.f32 %v985_v55  ;;  %v1436_v60 = vmul.f32 -1.442695, %v985_v55 }
 0xe62   :  { %v982_v57 = vpop.f32.mrf.mxu0 }
 0xe63   :  { %1730 = vpow2.f32 %v1436_v60  ;;  %v254_v60 = vld [vmem:[#allocation2 + $0x10] sm:$0xff] }
 0xe64   :  { %v1611_v58 = vpop.f32.mrf.mxu0 }
 0xe6e   :  { %v1729_v59 = vpop.eup %1728 }
 0xe6f   :  { %995 = vrot.lane.b32.xlu1 %v1729_v59, %s1803_s1  ;;  %v255_v59 = vld [vmem:[#allocation2 + $0x18] sm:$0xff] }
 0xe70   :  { %v1731_v61 = vpop.eup %1730  ;;  %1537 = vmatpush3.msra.mxu1 %v255_v59 }
 0xe71   :  { %v989_v62 = vadd.f32 1.0, %v1731_v61  ;;  %1538 = vmatprep.subr.mxu1 %v1799_v0  ;;  %v253_v61 = vld [vmem:[#allocation2 + $0x8] sm:$0xff] }
 0xe72   :  { %1539 = vmatpush3.msra.mxu1 %v254_v60 }
 0xe73   :  { %1732 = vrcp.f32 %v989_v62  ;;  %1540 = vmatprep.subr.mxu1 %v1799_v0  ;;  %v252_v62 = vld [vmem:[#allocation2] sm:$0xff] }
 0xe74   :  { %1541 = vmatpush3.msra.mxu1 %v253_v61 }
 0xe75   :  { %1542 = vmatprep.subr.mxu1 %v1799_v0 }
 0xe76   :  { %1543 = vmatpush3.msra.mxu1 %v252_v62 }
 0xe77   :  { %1555 = vmatprep.subr.mxu1 %v1799_v0 }
 0xe80   :  { %v1733_v63 = vpop.eup %1732 }
 0xe81   :  { %v993_v7 = vmul.f32 %v1733_v63, %v851_v40  ;;  %v46_v40 = vld [vmem:[%s2123_s0 + $0x38] sm:$0xff] }
 0xee1   :  { %v996_v4 = vpop.permute.xlu1 %995 }
 0xee2   :  { %v998_v6 = vmul.f32 %v1733_v63, %v996_v4 }
 0xee4   :  { %1000 = vrot.lane.b32.xlu1 %v998_v6, %s1804_s3 }
 0xf56   :  { %v1001_v8 = vpop.permute.xlu1 %1000 }
 0xf57   :  { %v1003_v9 = vadd.f32 %v1001_v8, %v993_v7 }
 0xf59   :  { %1734 = vtanh.f32 %v1003_v9 }
 0xf66   :  { %v1735_v10 = vpop.eup %1734 }
 0xf67   :  { %1006 = vrot.lane.b32.xlu0 %v1735_v10, %s1803_s1  ;;  %v557_v10 = vld [vmem:[#allocation2 + $0x58] sm:$0xff] }
 0xf6b   :  { %91 = vperm.xlu0 %1682, %v45_v12  }
 0xf6f   :  { %1685 = vset.pattern.permute.xlu0 %v1802_v5 }
 0xfd9   :  { %v1007_v16 = vpop.permute.xlu0 %1006 }
 0xfda   :  { %v2024_v17 = vmul.f32 %v1733_v63, %v1007_v16  ;;  %v556_v16 = vld [vmem:[#allocation2 + $0x50] sm:$0xff] }
 0xfdc   :  { %v1090_v18 = vpack.c.bf16 %v2024_v17, %v2024_v17 }
 0xfde   :  { %1092 = vrot.lane.b32.xlu1 %v1090_v18, %s1804_s3 }
 0xfe2   :  { %144 = vperm.xlu1 %1683, %v45_v12  }
 0xfe6   :  { %1684 = vset.pattern.permute.xlu1 %v1801_v1  ;;  %v92_v5 = vpop.permute.xlu0 %91 }
 0xfe7   :  { %v109_v21 = vmul.f32 %v1880_v11, %v92_v5  ;;  %v709_v5 = vld [vmem:[#allocation2 + $0x78] sm:$0xff] }
 0xfe9   :  { %v117_v23 = vadd.f32 %v1888_v15, %v109_v21 }
0x1050   :  { %v1093_v19 = vpop.permute.xlu1 %1092 }
0x1051   :  { %1628 = vmatmul.mubr.msk.bf16.vlgmr.msra.gmra.mxu0 %vm183_vm1, %v1093_v19 }
0x1052   :  { %1643 = vmatpush3.bf16.msra.mxu0 %v1855_v2  ;;  %1646 = vmatprep.mubr.msk.bf16.mxu0 %vm1800_vm0, %v1799_v0 }
0x1053   :  { %1644 = vmatprep.subr.bf16.mxu0 %v1799_v0 }
0x1056   :  { %1645 = vmatpush3.bf16.msra.mxu0 %v1861_v3 }
0x105d   :  { %v145_v22 = vpop.permute.xlu1 %144 }
0x105e   :  { %v161_v1 = vmul.f32 %v1883_v14, %v145_v22  ;;  %v708_v22 = vld [vmem:[#allocation2 + $0x70] sm:$0xff] }
0x1060   :  { %v169_v24 = vadd.f32 %v161_v1, %v117_v23  ;;  %v861_v23 = vld [vmem:[#allocation2 + $0x98] sm:$0xff] }
0x1111   :  { %v1131_v25 = vpop.f32.mrf.mxu0 }
0x1112   :  { %v1137_v26 = vadd.f32 %v1131_v25, %v169_v24  ;;  %v860_v24 = vld [vmem:[#allocation2 + $0x90] sm:$0xff]  ;;  %v859_v25 = vld [vmem:[#allocation2 + $0x88] sm:$0xff] }
0x1113   :  { %v1629_v27 = vpop.f32.mrf.mxu0 }
0x1114   :  { %1736 = vtanh.f32 %v1137_v26  ;;  %v1439_v30 = vmul.f32 -1.442695, %v1137_v26  ;;  %v858_v26 = vld [vmem:[#allocation2 + $0x80] sm:$0xff]  ;;  %v1013_v27 = vld [vmem:[#allocation2 + $0xb8] sm:$0xff] }
0x1115   :  { %v1134_v2 = vpop.f32.mrf.mxu0 }
0x1116   :  { %1738 = vpow2.f32 %v1439_v30  ;;  %v1010_v30 = vld [vmem:[#allocation2 + $0xa0] sm:$0xff] }
0x1117   :  { %v1630_v28 = vpop.f32.mrf.mxu0 }
0x1118   :  { %v1012_v28 = vld [vmem:[#allocation2 + $0xb0] sm:$0xff] }
0x1121   :  { %v1737_v29 = vpop.eup %1736 }
0x1122   :  { %1147 = vrot.lane.b32.xlu1 %v1737_v29, %s1803_s1  ;;  %v1011_v29 = vld [vmem:[#allocation2 + $0xa8] sm:$0xff] }
0x1123   :  { %v1739_v3 = vpop.eup %1738 }
0x1124   :  { %v1141_v31 = vadd.f32 1.0, %v1739_v3  ;;  %v1165_v3 = vld [vmem:[#allocation2 + $0xd8] sm:$0xff] }
0x1126   :  { %1740 = vrcp.f32 %v1141_v31 }
0x1133   :  { %v1741_v32 = vpop.eup %1740 }
0x1134   :  { %v1145_v35 = vmul.f32 %v1741_v32, %v1003_v9 }
0x1194   :  { %v1148_v33 = vpop.permute.xlu1 %1147 }
0x1195   :  { %v1150_v34 = vmul.f32 %v1741_v32, %v1148_v33  ;;  %v1163_v33 = vld [vmem:[#allocation2 + $0xc8] sm:$0xff] }
0x1197   :  { %1152 = vrot.lane.b32.xlu0 %v1150_v34, %s1804_s3  ;;  %v1162_v34 = vld [vmem:[#allocation2 + $0xc0] sm:$0xff] }
0x1209   :  { %v1153_v36 = vpop.permute.xlu0 %1152 }
0x120a   :  { %v1155_v37 = vadd.f32 %v1153_v36, %v1145_v35  ;;  %v1317_v35 = vld [vmem:[#allocation2 + $0xf8] sm:$0xff] }
0x120c   :  { %1742 = vtanh.f32 %v1155_v37 }
0x1219   :  { %v1743_v39 = vpop.eup %1742 }
0x121a   :  { %1158 = vrot.lane.b32.xlu1 %v1743_v39, %s1803_s1  ;;  %v1315_v39 = vld [vmem:[#allocation2 + $0xe8] sm:$0xff] }
0x121e   :  { %96 = vperm.xlu1 %1684, %v46_v40  }
0x128c   :  { %v1159_v41 = vpop.permute.xlu1 %1158 }
0x128d   :  { %v2045_v42 = vmul.f32 %v1741_v32, %v1159_v41  ;;  %v1164_v32 = vld [vmem:[#allocation2 + $0xd0] sm:$0xff] }
0x128f   :  { %v1242_v43 = vpack.c.bf16 %v2045_v42, %v2045_v42 }
0x1291   :  { %1244 = vrot.lane.b32.xlu0 %v1242_v43, %s1804_s3 }
0x1295   :  { %148 = vperm.xlu0 %1685, %v46_v40   ;;  %v1314_v40 = vld [vmem:[#allocation2 + $0xe0] sm:$0xff] }
0x1299   :  { %v97_v47 = vpop.permute.xlu1 %96 }
0x129a   :  { %v110_v48 = vmul.f32 %v1880_v11, %v97_v47 }
0x129c   :  { %v118_v50 = vadd.f32 %v1888_v15, %v110_v48 }
0x1303   :  { %v1245_v46 = vpop.permute.xlu0 %1244 }
0x1304   :  { %1647 = vmatmul.mubr.msk.bf16.vlgmr.msra.gmra.mxu0 %vm183_vm1, %v1245_v46 }
0x1310   :  { %v149_v49 = vpop.permute.xlu0 %148 }
0x1311   :  { %v162_v51 = vmul.f32 %v1883_v14, %v149_v49 }
0x1313   :  { %v170_v52 = vadd.f32 %v162_v51, %v118_v50 }
0x13c4   :  { %v1283_v53 = vpop.f32.mrf.mxu0 }
0x13c5   :  { %v1289_v54 = vadd.f32 %v1283_v53, %v170_v52 }
0x13c6   :  { %v1648_v55 = vpop.f32.mrf.mxu0 }
0x13c7   :  { %1744 = vtanh.f32 %v1289_v54  ;;  %v1442_v11 = vmul.f32 -1.442695, %v1289_v54 }
0x13c8   :  { %v1286_v56 = vpop.f32.mrf.mxu0 }
0x13c9   :  { %1746 = vpow2.f32 %v1442_v11 }
0x13ca   :  { %v1649_v57 = vpop.f32.mrf.mxu0 }
0x13d4   :  { %v1745_v58 = vpop.eup %1744 }
0x13d5   :  { %1299 = vrot.lane.b32.xlu1 %v1745_v58, %s1803_s1 }
0x13d6   :  { %v1747_v14 = vpop.eup %1746 }
0x13d7   :  { %v1293_v15 = vadd.f32 1.0, %v1747_v14 }
0x13d9   :  { %1748 = vrcp.f32 %v1293_v15 }
0x13e6   :  { %v1749_v63 = vpop.eup %1748 }
0x13e7   :  { %v1297_v7 = vmul.f32 %v1749_v63, %v1155_v37  ;;  %v1316_v37 = vld [vmem:[#allocation2 + $0xf0] sm:$0xff] }
0x1447   :  { %v1300_v4 = vpop.permute.xlu1 %1299 }
0x1448   :  { %v1302_v6 = vmul.f32 %v1749_v63, %v1300_v4 }
0x144a   :  { %1304 = vrot.lane.b32.xlu1 %v1302_v6, %s1804_s3 }
0x144e   :  { %408 = vrot.lane.b32.xlu1 %v1899_v38, %s1804_s3  ;;  %v555_v38 = vld [vmem:[#allocation2 + $0x48] sm:$0xff] }
0x1452   :  { %711 = vrot.lane.b32.xlu1 %v1978_v13, %s1804_s3  ;;  %v554_v13 = vld [vmem:[#allocation2 + $0x40] sm:$0xff] }
0x1456   :  { %1015 = vrot.lane.b32.xlu1 %v2024_v17, %s1804_s3 }
0x14bc   :  { %v1305_v8 = vpop.permute.xlu1 %1304 }
0x14bd   :  { %v1307_v9 = vadd.f32 %v1305_v8, %v1297_v7 }
0x14bf   :  { %1750 = vtanh.f32 %v1307_v9 }
0x14c0   :  { %v409_v12 = vpop.permute.xlu1 %408 }
0x14c1   :  { %1545 = vmatmul.mubr.msk.f32.vlgmr.msra.gmra.mxu1 %vm183_vm1, %v409_v12 }
0x14c2   :  { %1556 = vmatpush3.msra.mxu1 %v557_v10  ;;  %1563 = vmatprep.mubr.msk.f32.mxu1 %vm1800_vm0, %v1799_v0 }
0x14c3   :  { %1557 = vmatprep.subr.mxu1 %v1799_v0 }
0x14c4   :  { %1558 = vmatpush3.msra.mxu1 %v556_v16  ;;  %v712_v1 = vpop.permute.xlu1 %711 }
0x14c5   :  { %1559 = vmatprep.subr.mxu1 %v1799_v0 }
0x14c6   :  { %1560 = vmatpush3.msra.mxu1 %v555_v38 }
0x14c7   :  { %1561 = vmatprep.subr.mxu1 %v1799_v0 }
0x14c8   :  { %1562 = vmatpush3.msra.mxu1 %v554_v13  ;;  %v1016_v31 = vpop.permute.xlu1 %1015 }
0x14c9   :  { %1574 = vmatprep.subr.mxu1 %v1799_v0 }
0x14cc   :  { %v1751_v17 = vpop.eup %1750 }
0x14cd   :  { %1310 = vrot.lane.b32.xlu0 %v1751_v17, %s1803_s1 }
0x14d1   :  { %559 = vrot.lane.b32.xlu0 %v1955_v44, %s1804_s3  ;;  %v707_v44 = vld [vmem:[#allocation2 + $0x68] sm:$0xff] }
0x14d5   :  { %863 = vrot.lane.b32.xlu0 %v2001_v45, %s1804_s3  ;;  %v706_v45 = vld [vmem:[#allocation2 + $0x60] sm:$0xff] }
0x14d9   :  { %1167 = vrot.lane.b32.xlu0 %v2045_v42, %s1804_s3 }
0x153f   :  { %v1311_v18 = vpop.permute.xlu0 %1310 }
0x1540   :  { %v1313_v19 = vmul.f32 %v1749_v63, %v1311_v18 }
0x1542   :  { %1319 = vrot.lane.b32.xlu1 %v1313_v19, %s1804_s3 }
0x1543   :  { %v560_v21 = vpop.permute.xlu0 %559 }
0x1544   :  { %1564 = vmatmul.mubr.msk.f32.vlgmr.msra.gmra.mxu1 %vm183_vm1, %v560_v21 }
0x1545   :  { %1575 = vmatpush3.msra.mxu1 %v709_v5  ;;  %1582 = vmatprep.mubr.msk.f32.mxu1 %vm1800_vm0, %v1799_v0 }
0x1546   :  { %1576 = vmatprep.subr.mxu1 %v1799_v0 }
0x1547   :  { %1577 = vmatpush3.msra.mxu1 %v708_v22  ;;  %v864_v2 = vpop.permute.xlu0 %863 }
0x1548   :  { %1578 = vmatprep.subr.mxu1 %v1799_v0 }
0x1549   :  { %1579 = vmatpush3.msra.mxu1 %v707_v44 }
0x154a   :  { %1580 = vmatprep.subr.mxu1 %v1799_v0 }
0x154b   :  { %1581 = vmatpush3.msra.mxu1 %v706_v45  ;;  %v1168_v36 = vpop.permute.xlu0 %1167 }
0x154c   :  { %1583 = vmatmul.mubr.msk.f32.vlgmr.msra.gmra.mxu1 %vm183_vm1, %v712_v1  ;;  %1593 = vmatprep.subr.mxu1 %v1799_v0 }
0x154d   :  { %1594 = vmatpush3.msra.mxu1 %v861_v23  ;;  %1601 = vmatprep.mubr.msk.f32.mxu1 %vm1800_vm0, %v1799_v0 }
0x154e   :  { %1595 = vmatprep.subr.mxu1 %v1799_v0 }
0x154f   :  { %1596 = vmatpush3.msra.mxu1 %v860_v24 }
0x1550   :  { %1597 = vmatprep.subr.mxu1 %v1799_v0 }
0x1551   :  { %1598 = vmatpush3.msra.mxu1 %v859_v25 }
0x1552   :  { %1599 = vmatprep.subr.mxu1 %v1799_v0 }
0x1553   :  { %1600 = vmatpush3.msra.mxu1 %v858_v26 }
0x1554   :  { %1602 = vmatmul.mubr.msk.f32.vlgmr.msra.gmra.mxu1 %vm183_vm1, %v864_v2  ;;  %1612 = vmatprep.subr.mxu1 %v1799_v0 }
0x1555   :  { %1613 = vmatpush3.msra.mxu1 %v1013_v27  ;;  %1620 = vmatprep.mubr.msk.f32.mxu1 %vm1800_vm0, %v1799_v0 }
0x1556   :  { %1614 = vmatprep.subr.mxu1 %v1799_v0 }
0x1557   :  { %1615 = vmatpush3.msra.mxu1 %v1012_v28 }
0x1558   :  { %1616 = vmatprep.subr.mxu1 %v1799_v0 }
0x1559   :  { %1617 = vmatpush3.msra.mxu1 %v1011_v29 }
0x155a   :  { %1618 = vmatprep.subr.mxu1 %v1799_v0 }
0x155b   :  { %1619 = vmatpush3.msra.mxu1 %v1010_v30 }
0x155c   :  { %1621 = vmatmul.mubr.msk.f32.vlgmr.msra.gmra.mxu1 %vm183_vm1, %v1016_v31  ;;  %1631 = vmatprep.subr.mxu1 %v1799_v0 }
0x155d   :  { %1632 = vmatpush3.msra.mxu1 %v1165_v3  ;;  %1639 = vmatprep.mubr.msk.f32.mxu1 %vm1800_vm0, %v1799_v0 }
0x155e   :  { %1633 = vmatprep.subr.mxu1 %v1799_v0 }
0x155f   :  { %1634 = vmatpush3.msra.mxu1 %v1164_v32 }
0x1560   :  { %1635 = vmatprep.subr.mxu1 %v1799_v0 }
0x1561   :  { %1636 = vmatpush3.msra.mxu1 %v1163_v33 }
0x1562   :  { %1637 = vmatprep.subr.mxu1 %v1799_v0 }
0x1563   :  { %1638 = vmatpush3.msra.mxu1 %v1162_v34 }
0x1564   :  { %1640 = vmatmul.mubr.msk.f32.vlgmr.msra.gmra.mxu1 %vm183_vm1, %v1168_v36  ;;  %1650 = vmatprep.subr.mxu1 %v1799_v0 }
0x1565   :  { %1651 = vmatpush3.msra.mxu1 %v1317_v35  ;;  %1658 = vmatprep.mubr.msk.f32.mxu1 %vm1800_vm0, %v1799_v0 }
0x1566   :  { %1652 = vmatprep.subr.mxu1 %v1799_v0 }
0x1567   :  { %1653 = vmatpush3.msra.mxu1 %v1316_v37 }
0x1568   :  { %1654 = vmatprep.subr.mxu1 %v1799_v0 }
0x1569   :  { %1655 = vmatpush3.msra.mxu1 %v1315_v39 }
0x156a   :  { %1656 = vmatprep.subr.mxu1 %v1799_v0 }
0x156b   :  { %1657 = vmatpush3.msra.mxu1 %v1314_v40 }
0x1581   :  { %v478_v41 = vpop.f32.mrf.mxu1 }
0x1582   :  { %v479_v46 = vadd.f32 %v478_v41, %v1943_v20  ;;  %v1444_v20 = vld [vmem:[%s2128_s5] ss:$0 sm:$0xff] }
0x1583   :  { %v1546_v42 = vpop.f32.mrf.mxu1 }
0x15b4   :  { %v1320_v43 = vpop.permute.xlu1 %1319 }
0x15b5   :  { %1659 = vmatmul.mubr.msk.f32.vlgmr.msra.gmra.mxu1 %vm183_vm1, %v1320_v43 }
0x1604   :  { %v629_v47 = vpop.f32.mrf.mxu1 }
0x1605   :  { %v633_v48 = vadd.f32 %v629_v47, %v479_v46 }
0x1606   :  { %v1565_v49 = vpop.f32.mrf.mxu1 }
0x160c   :  { %v781_v50 = vpop.f32.mrf.mxu1 }
0x160d   :  { %v785_v51 = vadd.f32 %v781_v50, %v633_v48 }
0x160e   :  { %v1584_v52 = vpop.f32.mrf.mxu1 }
0x1614   :  { %v933_v53 = vpop.f32.mrf.mxu1 }
0x1615   :  { %v937_v54 = vadd.f32 %v933_v53, %v785_v51 }
0x1616   :  { %v1603_v55 = vpop.f32.mrf.mxu1 }
0x161c   :  { %v1085_v56 = vpop.f32.mrf.mxu1 }
0x161d   :  { %v1089_v57 = vadd.f32 %v1085_v56, %v937_v54 }
0x161e   :  { %v1622_v0 = vpop.f32.mrf.mxu1 }
0x1624   :  { %v1237_v58 = vpop.f32.mrf.mxu1 }
0x1625   :  { %v1241_v59 = vadd.f32 %v1237_v58, %v1089_v57 }
0x1626   :  { %v1641_v60 = vpop.f32.mrf.mxu1 }
0x1675   :  { %v1389_v11 = vpop.f32.mrf.mxu1 }
0x1676   :  { %v1393_v14 = vadd.f32 %v1389_v11, %v1241_v59 }
0x1677   :  { %v1660_v15 = vpop.f32.mrf.mxu1 }
0x1678   :  { %v1401_v61 = vadd.f32 %v1444_v20, %v1393_v14 }
0x167a   :  { %1402 = vst [vmem:[#allocation5] sm:$0xff] %v1401_v61 }
0x167b   :  { %1783 = shalt.err (!%p1780_p9)
}
0x167c   :  { %1412 = dma.vmem_to_hbm [thread:$0]  %s1410_s4, 128, %s2129_s6, [#allocation4]  }
0x167d   :  { %1794 = dma.done.wait [#allocation4], 128  }
0x167e   :  { %1795 = vsyncadd [#allocation4], 4294967168 }
0x167f   :  { %1416 = vsyncpa [#allocation3], 1 }
0x1680   :  { %1417 = vsyncpa [#allocation4], 1 }

</bundles_post_ra>
